<compile_context>
chip_gen: v6e
topology: v6e:2x2x1
jax: 0.10.0
libtpu: 0.0.40
codegen_flags: <defaults>
</compile_context>

<pallas_src>
import jax
import jax.numpy as jnp
from jax.experimental import pallas as pl
from jax.experimental.pallas import tpu as pltpu

_SUBLANE = 8                              # f32 sublane granularity
_VMEM_LIMIT_BYTES = 32 * 1024 * 1024      # portable scoped-VMEM budget (v7x: 64 MiB physical)
_MAX_BLOCK_B = 8192                       # upper cap on the batch tile (rows)
_MIN_ROWS_FOR_TC_SPLIT = 256              # force >=2 grid tiles above this (v7x dual-TC)


def _mlp_kernel(x_ref, w1_ref, b1_ref, w2_ref, b2_ref, out_ref):
    """One batch tile: relu(x @ W1 + b1) . W2 + b2.

    x_ref  : (TB, D_in)  VMEM (tiled over batch; last tile may be ragged)
    w1_ref : (D_in, H)   VMEM (resident across tiles)
    b1_ref : (1, H)      VMEM (resident)
    w2_ref : (1, H)      VMEM (resident, PyTorch layer_2.weight layout)
    b2_ref : (1, 1)      SMEM scalar
    out_ref: (TB, 1)     VMEM narrow logit column (OOB rows masked on store)
    """
    x = x_ref[...]                                                    # (TB, D_in)
    # Layer 1 on the MXU with f32 accumulation.
    h = jnp.dot(x, w1_ref[...], preferred_element_type=jnp.float32)  # (TB, H)
    h = jnp.maximum(h + b1_ref[...], 0.0)                            # bias + ReLU (VPU)
    # Layer 2 has a single output unit: VPU multiply + lane reduce instead of
    # driving the MXU with 1 useful column. Row-independent, so garbage in
    # ragged-tile padding rows cannot contaminate valid rows.
    y = jnp.sum(h * w2_ref[...], axis=-1, keepdims=True) + b2_ref[0, 0]   # (TB, 1)
    out_ref[...] = y.astype(out_ref.dtype)


def _round_up(x, m):
    return (x + m - 1) // m * m


def _pick_block_b(batch, d_in, hidden):
    """Largest multiple-of-8 batch tile fitting comfortably in scoped VMEM."""
    # Per-row bytes: double-buffered x tile + h intermediate + double-buffered
    # narrow output column.
    per_row = 4 * (2 * d_in + hidden + 2)
    resident = 4 * (d_in * hidden + 3 * hidden)      # resident weights + biases (approx)
    budget = max(_VMEM_LIMIT_BYTES // 2 - resident, per_row * _SUBLANE)
    tb = max(_SUBLANE, min(_MAX_BLOCK_B, (budget // per_row) // _SUBLANE * _SUBLANE))
    b_pad = _round_up(batch, _SUBLANE)
    tb = min(tb, b_pad)
    # For mid/large batches, guarantee >=2 grid tiles so the "parallel" batch
    # axis can shard across v7x's two TensorCores (neutral on v5e/v6e).
    if b_pad >= _MIN_ROWS_FOR_TC_SPLIT:
        tb = min(tb, _round_up(pl.cdiv(b_pad, 2), _SUBLANE))
    return tb


def simple_binary_classifier(x, w1, b1, w2, b2, *, block_b=None):
    """Forward pass of SimpleBinaryClassifier.

    Args:
      x:  (B, input_size) float32
      w1: (input_size, hidden_size) float32   (transposed PyTorch layer_1.weight)
      b1: (1, hidden_size) float32
      w2: (1, hidden_size) float32            (PyTorch layer_2.weight layout)
      b2: (1, 1) float32
    Returns:
      (B, 1) float32 logits
    """
    B, d_in = x.shape
    H = w1.shape[1]
    assert w1.shape == (d_in, H) and b1.shape == (1, H)
    assert w2.shape == (1, H) and b2.shape == (1, 1)

    if block_b is None:
        block_b = _pick_block_b(B, d_in, H)
    n_tiles = pl.cdiv(B, block_b)

    # No host-side padding: the last tile may be ragged; Pallas masks the
    # out-of-bounds output rows on store and the OOB input rows never reach
    # the returned logits (row-independent arithmetic).
    out = pl.pallas_call(
        _mlp_kernel,
        out_shape=jax.ShapeDtypeStruct((B, 1), jnp.float32),
        grid_spec=pltpu.PrefetchScalarGridSpec(
            num_scalar_prefetch=0,
            grid=(n_tiles,),
            in_specs=[
                pl.BlockSpec((block_b, d_in), lambda i: (i, 0)),     # x: tiled over batch
                pl.BlockSpec((d_in, H), lambda i: (0, 0)),           # w1: resident
                pl.BlockSpec((1, H), lambda i: (0, 0)),              # b1: resident
                pl.BlockSpec((1, H), lambda i: (0, 0)),              # w2: resident
                pl.BlockSpec(memory_space=pltpu.MemorySpace.SMEM),   # b2: scalar in SMEM
            ],
            out_specs=pl.BlockSpec((block_b, 1), lambda i: (i, 0)),
        ),
        compiler_params=pltpu.CompilerParams(
            dimension_semantics=("parallel",),   # batch tiles shard across v7x's 2 TCs
            vmem_limit_bytes=_VMEM_LIMIT_BYTES,
        ),
    )(x, w1, b1, w2, b2)
    return out


def init_params(key, input_size, hidden_size):
    """Deterministic init mimicking nn.Linear's uniform(-1/sqrt(fan_in), 1/sqrt(fan_in))."""
    k1, k2, k3, k4 = jax.random.split(key, 4)
    bound1 = 1.0 / jnp.sqrt(jnp.float32(input_size))
    bound2 = 1.0 / jnp.sqrt(jnp.float32(hidden_size))
    w1 = jax.random.uniform(k1, (input_size, hidden_size), jnp.float32,
                            minval=-bound1, maxval=bound1)
    b1 = jax.random.uniform(k2, (1, hidden_size), jnp.float32,
                            minval=-bound1, maxval=bound1)
    w2 = jax.random.uniform(k3, (1, hidden_size), jnp.float32,   # PyTorch layout (1, H)
                            minval=-bound2, maxval=bound2)
    b2 = jax.random.uniform(k4, (1, 1), jnp.float32,
                            minval=-bound2, maxval=bound2)
    return w1, b1, w2, b2


def _reference(x, w1, b1, w2, b2):
    return jnp.maximum(x @ w1 + b1, 0.0) @ w2.T + b2


if __name__ == "__main__":
    key = jax.random.PRNGKey(0)
    kx1, kx2, kx3, kp = jax.random.split(key, 4)

    input_size = 32
    hidden_size = 32
    w1, b1, w2, b2 = init_params(kp, input_size, hidden_size)

    ok = True
    # batch=64: aligned single-tile path; batch=20: ragged single-tile path;
    # batch=40 with block_b=16: multi-tile + ragged-last-tile path.
    cases = (
        (64, kx1, None),
        (20, kx2, None),
        (40, kx3, 16),
    )
    for batch, xkey, blk in cases:
        x = jax.random.normal(xkey, (batch, input_size), jnp.float32)
        logits = simple_binary_classifier(x, w1, b1, w2, b2, block_b=blk)
        jax.block_until_ready(logits)
        ref = _reference(x, w1, b1, w2, b2)
        ok &= (logits.shape == (batch, 1))
        ok &= bool(jnp.allclose(logits, ref, atol=1e-4, rtol=1e-4))
    assert ok

    print("KERNEL_OK")
</pallas_src>

<mosaic_0001>
module attributes {stable_mosaic.version = 11 : i64} {
  func.func @_mlp_kernel(%arg0: i32, %arg1: memref<64x32xf32, #tpu.memory_space<vmem>>, %arg2: memref<32x32xf32, #tpu.memory_space<vmem>>, %arg3: memref<1x32xf32, #tpu.memory_space<vmem>>, %arg4: memref<1x32xf32, #tpu.memory_space<vmem>>, %arg5: memref<1x1xf32, #tpu.memory_space<smem>>, %arg6: memref<64x1xf32, #tpu.memory_space<vmem>>) attributes {dimension_semantics = [#tpu.dimension_semantics<parallel>], iteration_bounds = array<i64: 1>, scalar_prefetch = 0 : i64, scratch_operands = 0 : i64, tpu.core_type = #tpu.core_type<tc>, window_params = [{transform_indices = @transform_0, window_bounds = array<i64: 64, 32>}, {pipeline_mode = #tpu.pipeline_mode<synchronous>, transform_indices = @transform_1, window_bounds = array<i64: 32, 32>}, {pipeline_mode = #tpu.pipeline_mode<synchronous>, transform_indices = @transform_2, window_bounds = array<i64: 1, 32>}, {pipeline_mode = #tpu.pipeline_mode<synchronous>, transform_indices = @transform_3, window_bounds = array<i64: 1, 32>}, {transform_indices = @transform_4, window_bounds = array<i64: 1, 1>}, {transform_indices = @transform_5, window_bounds = array<i64: 64, 1>}]} {
    %c0 = arith.constant 0 : index
    %c0_0 = arith.constant 0 : index
    %0 = vector.load %arg1[%c0, %c0_0] : memref<64x32xf32, #tpu.memory_space<vmem>>, vector<64x32xf32>
    %c0_1 = arith.constant 0 : index
    %c0_2 = arith.constant 0 : index
    %1 = vector.load %arg2[%c0_1, %c0_2] : memref<32x32xf32, #tpu.memory_space<vmem>>, vector<32x32xf32>
    %cst = arith.constant dense<0.000000e+00> : vector<64x32xf32>
    %2 = tpu.matmul %0, %1, %cst {dimension_numbers = #tpu.dot_dimension_numbers<[1], [0], [0], [1], [0, 0, 1, 1], [], []>} : vector<64x32xf32>, vector<32x32xf32>, vector<64x32xf32> -> vector<64x32xf32>
    %c0_3 = arith.constant 0 : index
    %c0_4 = arith.constant 0 : index
    %3 = vector.load %arg3[%c0_3, %c0_4] : memref<1x32xf32, #tpu.memory_space<vmem>>, vector<1x32xf32>
    %4 = vector.broadcast %3 : vector<1x32xf32> to vector<64x32xf32>
    %5 = arith.addf %2, %4 : vector<64x32xf32>
    %cst_5 = arith.constant 0.000000e+00 : f32
    %6 = vector.broadcast %cst_5 : f32 to vector<64x32xf32>
    %7 = arith.maximumf %5, %6 : vector<64x32xf32>
    %c0_6 = arith.constant 0 : index
    %c0_7 = arith.constant 0 : index
    %8 = vector.load %arg4[%c0_6, %c0_7] : memref<1x32xf32, #tpu.memory_space<vmem>>, vector<1x32xf32>
    %9 = vector.broadcast %8 : vector<1x32xf32> to vector<64x32xf32>
    %10 = arith.mulf %7, %9 : vector<64x32xf32>
    %cst_8 = arith.constant dense<0.000000e+00> : vector<64xf32>
    %11 = vector.multi_reduction <add>, %10, %cst_8 [1] : vector<64x32xf32> to vector<64xf32>
    %12 = vector.shape_cast %11 : vector<64xf32> to vector<64x1xf32>
    %c0_9 = arith.constant 0 : index
    %c0_10 = arith.constant 0 : index
    %13 = memref.load %arg5[%c0_9, %c0_10] : memref<1x1xf32, #tpu.memory_space<smem>>
    %14 = vector.broadcast %13 : f32 to vector<64x1xf32>
    %15 = arith.addf %12, %14 : vector<64x1xf32>
    %c0_11 = arith.constant 0 : index
    %c0_12 = arith.constant 0 : index
    %16 = vector.load %arg6[%c0_11, %c0_12] : memref<64x1xf32, #tpu.memory_space<vmem>>, vector<64x1xf32>
    tpu.vector_store %arg6[%c0_11, %c0_12], %15 {strides = array<i32>} : memref<64x1xf32, #tpu.memory_space<vmem>>, vector<64x1xf32>,
    return
  }
  func.func @transform_0(%arg0: i32) -> (i32, i32) {
    %c0_i32 = arith.constant 0 : i32
    %c0_i32_0 = arith.constant 0 : i32
    return %arg0, %c0_i32 : i32, i32
  }
  func.func @transform_1(%arg0: i32) -> (i32, i32) {
    %c0_i32 = arith.constant 0 : i32
    %c0_i32_0 = arith.constant 0 : i32
    %c0_i32_1 = arith.constant 0 : i32
    return %c0_i32, %c0_i32_0 : i32, i32
  }
  func.func @transform_2(%arg0: i32) -> (i32, i32) {
    %c0_i32 = arith.constant 0 : i32
    %c0_i32_0 = arith.constant 0 : i32
    %c0_i32_1 = arith.constant 0 : i32
    return %c0_i32, %c0_i32_0 : i32, i32
  }
  func.func @transform_3(%arg0: i32) -> (i32, i32) {
    %c0_i32 = arith.constant 0 : i32
    %c0_i32_0 = arith.constant 0 : i32
    %c0_i32_1 = arith.constant 0 : i32
    return %c0_i32, %c0_i32_0 : i32, i32
  }
  func.func @transform_4(%arg0: i32) -> (i32, i32) {
    %c0_i32 = arith.constant 0 : i32
    %c0_i32_0 = arith.constant 0 : i32
    %c0_i32_1 = arith.constant 0 : i32
    return %c0_i32, %c0_i32_0 : i32, i32
  }
  func.func @transform_5(%arg0: i32) -> (i32, i32) {
    %c0_i32 = arith.constant 0 : i32
    %c0_i32_0 = arith.constant 0 : i32
    return %arg0, %c0_i32 : i32, i32
  }
}

</mosaic_0001>

<bundles_post_ra>
// kernel: tpu_custom_call.1
= control target key start
LH: loop header
LB: loop body
LE: loop exit
PB: predicated region body
PF: predicated region fallthrough
CT: control target
= control target key end

     0   :  { %vm40_vm0 = vcmask 261120   ;;  %vm227_vm1 = vcmask 7168   ;;  %s413_s1 = inlined_call_operand.vmem [shape: f32[32,32], index: 1, kind: input, shape index: {}]   ;;  %s414_s0 = inlined_call_operand.vmem [shape: f32[64,32], index: 0, kind: input, shape index: {}]   ;;  %s415_s2 = inlined_call_operand.vmem [shape: f32[1,32], index: 2, kind: input, shape index: {}]   ;;  %s416_s3 = inlined_call_operand.vmem [shape: f32[1,32], index: 3, kind: input, shape index: {}]   ;;  %s417_s4 = inlined_call_operand.<no memory space> [shape: f32[1,1], index: 4, kind: input, shape index: {}]   ;;  %s418_s5 = inlined_call_operand.vmem [shape: f32[64,1], index: 5, kind: output, shape index: {}]  }
   0x1   :  { %v32_v0 = vld [vmem:[%s413_s1 + $0x18] sm:$0xff]  ;;  %v31_v1 = vld [vmem:[%s413_s1 + $0x10] sm:$0xff]  ;;  %v30_v2 = vld [vmem:[%s413_s1 + $0x8] sm:$0xff]  ;;  %v218_v54 = vstv %s417_s4 }
   0x2   :  { %262 = vmatprep.subr.mxu0 %v32_v0  ;;  %282 = vmatprep.subr.mxu1 %v32_v0  ;;  %v29_v3 = vld [vmem:[%s413_s1] sm:$0xff]  ;;  %v22_v6 = vld [vmem:[%s414_s0 + $0x8] sm:$0xff]  ;;  %v23_v8 = vld [vmem:[%s414_s0 + $0x10] sm:$0xff] }
   0x3   :  { %263 = vmatpush3.msra.mxu0 %v32_v0  ;;  %286 = vmatpush3.msra.mxu1 %v32_v0  ;;  %v21_v4 = vld [vmem:[%s414_s0] sm:$0xff]  ;;  %v26_v7 = vld [vmem:[%s414_s0 + $0x28] sm:$0xff]  ;;  %v27_v9 = vld [vmem:[%s414_s0 + $0x30] sm:$0xff] }
   0x4   :  { %264 = vmatprep.subr.mxu0 %v31_v1  ;;  %283 = vmatprep.subr.mxu1 %v31_v1  ;;  %v25_v5 = vld [vmem:[%s414_s0 + $0x20] sm:$0xff]  ;;  %v24_v10 = vld [vmem:[%s414_s0 + $0x18] sm:$0xff] }
   0x5   :  { %265 = vmatpush3.msra.mxu0 %v31_v1  ;;  %287 = vmatpush3.msra.mxu1 %v31_v1  ;;  %v28_v11 = vld [vmem:[%s414_s0 + $0x38] sm:$0xff]  ;;  %v240_v12 = vld [vmem:[%s415_s2] ss:$0 sm:$0xff] }
   0x6   :  { %266 = vmatprep.subr.mxu0 %v30_v2  ;;  %284 = vmatprep.subr.mxu1 %v30_v2  ;;  %v249_v19 = vld [vmem:[%s416_s3] ss:$0 sm:$0xff] }
   0x7   :  { %267 = vmatpush3.msra.mxu0 %v30_v2  ;;  %288 = vmatpush3.msra.mxu1 %v30_v2 }
   0x8   :  { %268 = vmatprep.subr.mxu0 %v29_v3  ;;  %285 = vmatprep.subr.mxu1 %v29_v3 }
   0x9   :  { %269 = vmatpush3.msra.mxu0 %v29_v3  ;;  %289 = vmatpush3.msra.mxu1 %v29_v3 }
   0xa   :  { %270 = vmatprep.mubr.msk.f32.mxu0 %vm40_vm0, %v21_v4  ;;  %276 = vmatprep.mubr.msk.f32.mxu1 %vm40_vm0, %v25_v5 }
   0xb   :  { %271 = vmatmul.mubr.msk.f32.vlgmr.msra.gmra.mxu0 %vm40_vm0, %v22_v6  ;;  %277 = vmatmul.mubr.msk.f32.vlgmr.msra.gmra.mxu1 %vm40_vm0, %v26_v7 }
   0xc   :  { %273 = vmatprep.mubr.msk.f32.mxu0 %vm40_vm0, %v23_v8  ;;  %279 = vmatprep.mubr.msk.f32.mxu1 %vm40_vm0, %v27_v9 }
   0xf   :  { %274 = vmatmul.mubr.msk.f32.gmra.mxu0 %vm40_vm0, %v24_v10  ;;  %280 = vmatmul.mubr.msk.f32.gmra.mxu1 %vm40_vm0, %v28_v11 }
  0xcb   :  { %v272_v13 = vpop.f32.mrf.mxu0  ;;  %v278_v14 = vpop.f32.mrf.mxu1 }
  0xcc   :  { %v137_v15 = vadd.f32 %v272_v13, %v240_v12  ;;  %v157_v16 = vadd.f32 %v278_v14, %v240_v12 }
  0xcd   :  { %v131_v17 = vpop.f32.mrf.mxu0  ;;  %v151_v18 = vpop.f32.mrf.mxu1 }
  0xce   :  { %v171_v20 = vmax.f32 %v137_v15, 0.0  ;;  %v175_v21 = vmax.f32 %v157_v16, 0.0  ;;  %v132_v22 = vadd.f32 %v240_v12, %v131_v17  ;;  %v152_v23 = vadd.f32 %v240_v12, %v151_v18 }
  0xcf   :  { %v275_v24 = vpop.f32.mrf.mxu0  ;;  %v281_v25 = vpop.f32.mrf.mxu1 }
  0xd0   :  { %v170_v26 = vmax.f32 %v132_v22, 0.0  ;;  %v147_v27 = vadd.f32 %v275_v24, %v240_v12  ;;  %v190_v28 = vmul.f32 %v249_v19, %v175_v21  ;;  %v186_v30 = vmul.f32 %v249_v19, %v171_v20 }
  0xd1   :  { %v141_v29 = vpop.f32.mrf.mxu0  ;;  %v161_v31 = vpop.f32.mrf.mxu1  ;;  %v167_v35 = vadd.f32 %v281_v25, %v240_v12  ;;  %v174_v36 = vmax.f32 %v152_v23, 0.0 }
  0xd2   :  { %v173_v32 = vmax.f32 %v147_v27, 0.0  ;;  %v142_v33 = vadd.f32 %v240_v12, %v141_v29  ;;  %v208_v34 = vsel %vm40_vm0, %v190_v28, 0.0  ;;  %v196_v37 = vsel %vm40_vm0, %v186_v30, 0.0 }
  0xd3   :  { %209 = vadd.xlane.f32.xlu1 %v208_v34  ;;  %v162_v38 = vadd.f32 %v240_v12, %v161_v31  ;;  %v185_v39 = vmul.f32 %v249_v19, %v170_v26  ;;  %197 = vadd.xlane.f32.xlu0 %v196_v37  ;;  %v177_v42 = vmax.f32 %v167_v35, 0.0  ;;  %v189_v47 = vmul.f32 %v249_v19, %v174_v36 }
  0xd4   :  { %v172_v40 = vmax.f32 %v142_v33, 0.0  ;;  %v188_v41 = vmul.f32 %v249_v19, %v173_v32 }
  0xd5   :  { %v176_v45 = vmax.f32 %v162_v38, 0.0  ;;  %v193_v46 = vsel %vm40_vm0, %v185_v39, 0.0  ;;  %v192_v49 = vmul.f32 %v249_v19, %v177_v42  ;;  %v205_v50 = vsel %vm40_vm0, %v189_v47, 0.0 }
  0xd6   :  { %v202_v43 = vsel %vm40_vm0, %v188_v41, 0.0  ;;  %v187_v44 = vmul.f32 %v249_v19, %v172_v40 }
  0xd7   :  { %203 = vadd.xlane.f32.xlu1 %v202_v43  ;;  %194 = vadd.xlane.f32.xlu0 %v193_v46  ;;  %v191_v51 = vmul.f32 %v249_v19, %v176_v45  ;;  %v214_v52 = vsel %vm40_vm0, %v192_v49, 0.0 }
  0xd8   :  { %v199_v48 = vsel %vm40_vm0, %v187_v44, 0.0 }
  0xd9   :  { %v211_v53 = vsel %vm40_vm0, %v191_v51, 0.0 }
  0xdb   :  { %200 = vadd.xlane.f32.xlu1 %v199_v48  ;;  %206 = vadd.xlane.f32.xlu0 %v205_v50 }
  0xdf   :  { %215 = vadd.xlane.f32.xlu1 %v214_v52  ;;  %212 = vadd.xlane.f32.xlu0 %v211_v53 }
 0x15c   :  { %v210_v55 = vpop.xlane.xlu1 %209  ;;  %v198_v57 = vpop.xlane.xlu0 %197 }
 0x15d   :  { %v224_v56 = vadd.f32 %v218_v54, %v210_v55  ;;  %v220_v58 = vadd.f32 %v218_v54, %v198_v57 }
 0x15f   :  { %233 = vst.msk [vmem:[%s418_s5 + $0x28] sm:$0xff] %vm227_vm1, %v224_v56  ;;  %229 = vst.msk [vmem:[%s418_s5 + $0x8] sm:$0xff] %vm227_vm1, %v220_v58 }
 0x160   :  { %v204_v59 = vpop.xlane.xlu1 %203  ;;  %v195_v61 = vpop.xlane.xlu0 %194 }
 0x161   :  { %v222_v60 = vadd.f32 %v218_v54, %v204_v59  ;;  %v219_v62 = vadd.f32 %v218_v54, %v195_v61 }
 0x163   :  { %231 = vst.msk [vmem:[%s418_s5 + $0x18] sm:$0xff] %vm227_vm1, %v222_v60  ;;  %228 = vst.msk [vmem:[%s418_s5] sm:$0xff] %vm227_vm1, %v219_v62 }
 0x164   :  { %v201_v63 = vpop.xlane.xlu1 %200  ;;  %v207_v1 = vpop.xlane.xlu0 %206 }
 0x165   :  { %v221_v0 = vadd.f32 %v218_v54, %v201_v63  ;;  %v223_v2 = vadd.f32 %v218_v54, %v207_v1 }
 0x167   :  { %230 = vst.msk [vmem:[%s418_s5 + $0x10] sm:$0xff] %vm227_vm1, %v221_v0  ;;  %232 = vst.msk [vmem:[%s418_s5 + $0x20] sm:$0xff] %vm227_vm1, %v223_v2 }
 0x168   :  { %v216_v3 = vpop.xlane.xlu1 %215  ;;  %v213_v5 = vpop.xlane.xlu0 %212 }
 0x169   :  { %v226_v4 = vadd.f32 %v218_v54, %v216_v3  ;;  %v225_v6 = vadd.f32 %v218_v54, %v213_v5 }
 0x16b   :  { %235 = vst.msk [vmem:[%s418_s5 + $0x38] sm:$0xff] %vm227_vm1, %v226_v4  ;;  %234 = vst.msk [vmem:[%s418_s5 + $0x30] sm:$0xff] %vm227_vm1, %v225_v6 }

</bundles_post_ra>
